<compile_context>
chip_gen: v7x
topology: tpu7x:2x2x1
jax: 0.10.0
libtpu: 0.0.40
codegen_flags: <defaults>
</compile_context>

<pallas_src>
import math
import functools

import jax
import jax.numpy as jnp
from jax.experimental import pallas as pl
from jax.experimental.pallas import tpu as pltpu


# ----------------------------------------------------------------------------
# Tiled Pallas matmul: bf16 operands, f32 accumulation directly in the output
# block (no separate accumulator scratch), M/N/K grid with K innermost.
# ----------------------------------------------------------------------------
def _mm_kernel(a_ref, b_ref, o_ref):
    acc = jnp.dot(a_ref[...], b_ref[...], preferred_element_type=jnp.float32)

    @pl.when(pl.program_id(2) == 0)
    def _first():
        o_ref[...] = acc

    @pl.when(pl.program_id(2) != 0)
    def _accumulate():
        o_ref[...] += acc


def _round_up(x, m):
    return ((x + m - 1) // m) * m


def pallas_matmul(a, b, *, tm=256, tn=256, tk=512,
                  compute_dtype=jnp.bfloat16):
    """a: (M, K), b: (K, N)  ->  (M, N) f32, computed on the MXU.

    Operands are cast to `compute_dtype` (bf16 by default), accumulation is f32.
    """
    M, K = a.shape
    K2, N = b.shape
    assert K == K2, f"inner dims mismatch: {K} vs {K2}"

    itemsize = 2 if compute_dtype == jnp.bfloat16 else 4
    sub = 16 if compute_dtype == jnp.bfloat16 else 8   # sublane packing multiple

    # M tile: multiple of the sublane packing (or the full padded extent).
    tm_eff = min(tm, _round_up(M, sub))
    Mp = _round_up(M, tm_eff)
    # N tile: keep the output lane dimension a multiple of 128 (avoid vst.msk).
    tn_eff = min(tn, _round_up(N, 128))
    Np = _round_up(N, tn_eff)
    # K: if it fits in one block, use the FULL extent (exempt from the (8,128)
    # rule) and skip padding entirely; otherwise tile/pad to multiples of tk.
    if K <= tk:
        tk_eff, Kp = K, K
    else:
        tk_eff = tk
        Kp = _round_up(K, tk_eff)

    a_p = a.astype(compute_dtype)
    b_p = b.astype(compute_dtype)
    if (Mp, Kp) != (M, K):
        a_p = jnp.pad(a_p, ((0, Mp - M), (0, Kp - K)))
    if (Kp, Np) != (K, N):
        b_p = jnp.pad(b_p, ((0, Kp - K), (0, Np - N)))

    grid = (Mp // tm_eff, Np // tn_eff, Kp // tk_eff)

    cost = pl.CostEstimate(
        flops=2 * Mp * Np * Kp,
        transcendentals=0,
        bytes_accessed=(Mp * Kp + Kp * Np) * itemsize + Mp * Np * 4,
    )

    out = pl.pallas_call(
        _mm_kernel,
        out_shape=jax.ShapeDtypeStruct((Mp, Np), jnp.float32),
        grid_spec=pltpu.PrefetchScalarGridSpec(
            num_scalar_prefetch=0,
            grid=grid,
            in_specs=[
                pl.BlockSpec((tm_eff, tk_eff), lambda i, j, k: (i, k)),
                pl.BlockSpec((tk_eff, tn_eff), lambda i, j, k: (k, j)),
            ],
            out_specs=pl.BlockSpec((tm_eff, tn_eff), lambda i, j, k: (i, j)),
        ),
        compiler_params=pltpu.CompilerParams(
            dimension_semantics=("parallel", "parallel", "arbitrary"),
            vmem_limit_bytes=48 * 1024 * 1024,   # safe on v5e/v6e (128 MiB) and v7x (64 MiB)
        ),
        cost_estimate=cost,
    )(a_p, b_p)

    return out[:M, :N]


# ----------------------------------------------------------------------------
# Glue: enforce_sparsity, sparse-weight densification, im2col
# ----------------------------------------------------------------------------
def _enforce_sparsity(lookup_indices, lookup_coefficients, sparsity):
    """Mirror of LCNNConv2d.enforce_sparsity (including its index/coeff pairing:
    indices are permuted by the |coeff| sort order, coefficients are only masked)."""
    order = jnp.argsort(-jnp.abs(lookup_coefficients), axis=-1)    # descending |coeff|
    rank = jnp.argsort(order, axis=-1)                             # rank of each original slot
    coeff = jnp.where(rank < sparsity, lookup_coefficients, 0.0)   # masked_fill_ of non-top-k
    new_idx = jnp.take_along_axis(lookup_indices, order, axis=-1)  # gather(indices, sorted_idx)
    return new_idx, coeff


def _dense_lookup_weight(new_idx, coeff, dictionary_size, out_channels, kh, kw):
    """Densify the COO weight with a scatter-add (duplicates summed, like
    coalescing in torch.sparse.mm)."""
    # TODO(synk): torch.sparse_coo_tensor / torch.sparse.mm have no Pallas
    # equivalent; duplicate indices are summed by this plain-JAX scatter-add.
    o_ix = jnp.arange(out_channels, dtype=new_idx.dtype)[:, None, None, None]
    i_ix = jnp.arange(kh, dtype=new_idx.dtype)[None, :, None, None]
    j_ix = jnp.arange(kw, dtype=new_idx.dtype)[None, None, :, None]
    w = jnp.zeros((dictionary_size, out_channels, kh, kw), coeff.dtype)
    return w.at[new_idx, o_ix, i_ix, j_ix].add(coeff)              # (D, C_out, kh, kw)


def _im2col(x, kh, kw, stride, padding):
    B, C_in, H, W = x.shape
    sh, sw = stride
    ph, pw = padding
    x_pad = jnp.pad(x, ((0, 0), (0, 0), (ph, ph), (pw, pw)))
    Hp, Wp = H + 2 * ph, W + 2 * pw
    H_out = (Hp - kh) // sh + 1
    W_out = (Wp - kw) // sw + 1
    cols = []
    for i in range(kh):
        for j in range(kw):
            cols.append(x_pad[:, :, i:i + sh * H_out:sh, j:j + sw * W_out:sw])
    patches = jnp.stack(cols, axis=2)                              # (B,Cin,kh*kw,Ho,Wo)
    patches = patches.transpose(0, 3, 4, 1, 2).reshape(B * H_out * W_out,
                                                       C_in * kh * kw)
    return patches, H_out, W_out


# ----------------------------------------------------------------------------
# LCNNConv2d forward (fused single-GEMM formulation)
# ----------------------------------------------------------------------------
def lcnn_conv2d_forward(x, dictionary, lookup_indices, lookup_coefficients,
                        stride=(1, 1), padding=(0, 0), sparsity=3,
                        matmul=None):
    """Exact re-implementation of LCNNConv2d.forward.

    x:                    (B, C_in, H, W)          f32   (NCHW)
    dictionary:           (D, C_in, kh, kw)        f32
    lookup_indices:       (C_out, kh, kw, S)       int32 in [0, D)
    lookup_coefficients:  (C_out, kh, kw, S)       f32
    """
    B, C_in, H, W = x.shape
    D, C_in2, kh, kw = dictionary.shape
    C_out, kh2, kw2, S = lookup_indices.shape
    assert C_in == C_in2 and kh == kh2 and kw == kw2

    if matmul is None:
        matmul = pallas_matmul

    new_idx, coeff = _enforce_sparsity(lookup_indices, lookup_coefficients, sparsity)
    w_dense = _dense_lookup_weight(new_idx, coeff, D, C_out, kh, kw)   # (D,C_out,kh,kw)

    patches, H_out, W_out = _im2col(x, kh, kw, stride, padding)        # (B*Ho*Wo, Cin*kh*kw)

    # The reference's flat view / sparse.mm / .t() only type-checks when
    # kh*kw == H_out*W_out == 1; the GEMM fusion below relies on the same regime.
    assert kh * kw == H_out * W_out, (
        "reference sparse.mm requires kh*kw == H_out*W_out")
    assert H_out * W_out == 1, (
        "reference final .view requires H_out*W_out == 1")

    dict_mat = dictionary.reshape(D, C_in * kh * kw)       # (D, K)
    w2 = w_dense.reshape(C_out, D * kh * kw)               # flat reinterpret -> (C_out, D)

    # Fused effective weight:  out = (patches @ dict^T) @ w2^T = patches @ W_eff.
    # W_eff is (K, C_out) and tiny, so it is built in plain-JAX glue (no explicit
    # transpose copies thanks to einsum); the single large GEMM runs in Pallas.
    w_eff = jnp.einsum("dk,od->ko", dict_mat, w2,
                       precision=jax.lax.Precision.HIGHEST,
                       preferred_element_type=jnp.float32)

    out = matmul(patches, w_eff)                           # (B*Ho*Wo, C_out)
    return out.reshape(B, C_out, H_out, W_out)


# ----------------------------------------------------------------------------
# Pure-JAX, f32, step-by-step port of the PyTorch forward (independent check:
# unfused two-step product, conv2d, one_hot densification).
# ----------------------------------------------------------------------------
def lcnn_conv2d_reference(x, dictionary, lookup_indices, lookup_coefficients,
                          stride=(1, 1), padding=(0, 0), sparsity=3):
    B = x.shape[0]
    D, _, kh, kw = dictionary.shape
    C_out = lookup_indices.shape[0]
    ph, pw = padding

    new_idx, coeff = _enforce_sparsity(lookup_indices, lookup_coefficients, sparsity)
    onehot = jax.nn.one_hot(new_idx, D, dtype=coeff.dtype)        # (C_out,kh,kw,S,D)
    w_dense = jnp.einsum("oijs,oijsd->doij", coeff, onehot)       # (D,C_out,kh,kw)

    idict = jax.lax.conv_general_dilated(
        x, dictionary, window_strides=stride,
        padding=[(ph, ph), (pw, pw)],
        dimension_numbers=("NCHW", "OIHW", "NCHW"),
        precision=jax.lax.Precision.HIGHEST)                      # (B, D, Ho, Wo)
    _, _, H_out, W_out = idict.shape

    w2 = w_dense.reshape(C_out, D * kh * kw)
    i2 = idict.reshape(B, D * H_out * W_out)
    out = jnp.dot(i2, w2.T, precision=jax.lax.Precision.HIGHEST,
                  preferred_element_type=jnp.float32)
    return out.reshape(B, C_out, H_out, W_out)


# ----------------------------------------------------------------------------
# Deterministic parameter init (mirrors LCNNConv2d.__init__ / reset_parameters)
# ----------------------------------------------------------------------------
def init_lcnn_params(key, in_channels, out_channels, kernel_size,
                     dictionary_size, sparsity):
    kh, kw = kernel_size
    k1, k2, k3 = jax.random.split(key, 3)
    bound_d = math.sqrt(6.0 / (in_channels * kh * kw))            # kaiming_uniform_
    dictionary = jax.random.uniform(
        k1, (dictionary_size, in_channels, kh, kw), jnp.float32,
        -bound_d, bound_d)
    bound_c = math.sqrt(6.0 / (kh * kw * sparsity))               # kaiming_uniform_
    lookup_coefficients = jax.random.uniform(
        k2, (out_channels, kh, kw, sparsity), jnp.float32, -bound_c, bound_c)
    lookup_indices = jax.random.randint(
        k3, (out_channels, kh, kw, sparsity), 0, dictionary_size, jnp.int32)
    return dictionary, lookup_indices, lookup_coefficients


if __name__ == "__main__":
    key = jax.random.PRNGKey(0)
    kparam, kx, kg1, kg2 = jax.random.split(key, 4)

    # ---- standalone GEMM smoke test: exercises M/N/K tiling + K padding ------
    A = jax.random.normal(kg1, (384, 640), jnp.float32)
    Bm = jax.random.normal(kg2, (640, 384), jnp.float32)
    C = pallas_matmul(A, Bm, tm=128, tn=128, tk=256)
    C = jax.block_until_ready(C)
    C_ref = jnp.dot(A.astype(jnp.bfloat16), Bm.astype(jnp.bfloat16),
                    preferred_element_type=jnp.float32)
    assert C.shape == (384, 384), C.shape
    assert jnp.allclose(C, C_ref, atol=1e-2, rtol=1e-2), (
        float(jnp.max(jnp.abs(C - C_ref))))

    # ---- LCNNConv2d forward (regime where the PyTorch reference is valid) ----
    # kernel_size = (1,1), conv output spatial = 1x1.
    B, C_in, C_out = 2, 16, 8
    kernel_size = (1, 1)
    H = W = 1
    dictionary_size, sparsity = 100, 3
    stride, padding = (1, 1), (0, 0)

    dictionary, lookup_indices, lookup_coefficients = init_lcnn_params(
        kparam, C_in, C_out, kernel_size, dictionary_size, sparsity)
    x = jax.random.normal(kx, (B, C_in, H, W), jnp.float32)

    fwd = functools.partial(
        lcnn_conv2d_forward, stride=stride, padding=padding, sparsity=sparsity)

    y = fwd(x, dictionary, lookup_indices, lookup_coefficients)
    y = jax.block_until_ready(y)
    assert y.shape == (B, C_out, 1, 1), y.shape

    # Tight check: same fused math & same bf16 operand rounding, jnp.dot GEMM.
    y_fused = fwd(x, dictionary, lookup_indices, lookup_coefficients,
                  matmul=lambda a, b: jnp.dot(a.astype(jnp.bfloat16),
                                              b.astype(jnp.bfloat16),
                                              preferred_element_type=jnp.float32))
    assert jnp.allclose(y, y_fused, atol=1e-4, rtol=1e-4), (
        float(jnp.max(jnp.abs(y - y_fused))))

    # Loose check: independent f32, unfused, step-by-step port of the PyTorch
    # forward (bf16 operand rounding + fusion reorder bound the difference).
    y_ref = lcnn_conv2d_reference(x, dictionary, lookup_indices,
                                  lookup_coefficients,
                                  stride=stride, padding=padding,
                                  sparsity=sparsity)
    assert jnp.allclose(y, y_ref, atol=5e-2, rtol=5e-2), (
        float(jnp.max(jnp.abs(y - y_ref))))

    print("KERNEL_OK")
</pallas_src>

<mosaic_0001>
module attributes {stable_mosaic.version = 11 : i64} {
  func.func @_mm_kernel(%arg0: i32, %arg1: i32, %arg2: i32, %arg3: memref<128x256xbf16, #tpu.memory_space<vmem>>, %arg4: memref<256x128xbf16, #tpu.memory_space<vmem>>, %arg5: memref<128x128xf32, #tpu.memory_space<vmem>>) attributes {dimension_semantics = [#tpu.dimension_semantics<parallel>, #tpu.dimension_semantics<parallel>, #tpu.dimension_semantics<arbitrary>], iteration_bounds = array<i64: 3, 3, 3>, scalar_prefetch = 0 : i64, scratch_operands = 0 : i64, tpu.core_type = #tpu.core_type<tc>, window_params = [{transform_indices = @transform_0, window_bounds = array<i64: 128, 256>}, {transform_indices = @transform_1, window_bounds = array<i64: 256, 128>}, {transform_indices = @transform_2, window_bounds = array<i64: 128, 128>}]} {
    %c0 = arith.constant 0 : index
    %c0_0 = arith.constant 0 : index
    %0 = vector.load %arg3[%c0, %c0_0] : memref<128x256xbf16, #tpu.memory_space<vmem>>, vector<128x256xbf16>
    %c0_1 = arith.constant 0 : index
    %c0_2 = arith.constant 0 : index
    %1 = vector.load %arg4[%c0_1, %c0_2] : memref<256x128xbf16, #tpu.memory_space<vmem>>, vector<256x128xbf16>
    %cst = arith.constant dense<0.000000e+00> : vector<128x128xf32>
    %2 = tpu.matmul %0, %1, %cst {dimension_numbers = #tpu.dot_dimension_numbers<[1], [0], [0], [1], [0, 0, 1, 1], [], []>} : vector<128x256xbf16>, vector<256x128xbf16>, vector<128x128xf32> -> vector<128x128xf32>
    %c0_i32 = arith.constant 0 : i32
    %3 = arith.cmpi eq, %arg2, %c0_i32 : i32
    %4 = arith.extui %3 : i1 to i32
    %c0_i32_3 = arith.constant 0 : i32
    %5 = arith.cmpi ne, %4, %c0_i32_3 : i32
    scf.if %5 {
      %c0_6 = arith.constant 0 : index
      %c0_7 = arith.constant 0 : index
      %9 = vector.load %arg5[%c0_6, %c0_7] : memref<128x128xf32, #tpu.memory_space<vmem>>, vector<128x128xf32>
      tpu.vector_store %arg5[%c0_6, %c0_7], %2 {strides = array<i32>} : memref<128x128xf32, #tpu.memory_space<vmem>>, vector<128x128xf32>,
    } else {
    }
    %c0_i32_4 = arith.constant 0 : i32
    %6 = arith.cmpi ne, %arg2, %c0_i32_4 : i32
    %7 = arith.extui %6 : i1 to i32
    %c0_i32_5 = arith.constant 0 : i32
    %8 = arith.cmpi ne, %7, %c0_i32_5 : i32
    scf.if %8 {
      %c0_6 = arith.constant 0 : index
      %c0_7 = arith.constant 0 : index
      %9 = vector.load %arg5[%c0_6, %c0_7] : memref<128x128xf32, #tpu.memory_space<vmem>>, vector<128x128xf32>
      %10 = arith.addf %9, %2 : vector<128x128xf32>
      %c0_8 = arith.constant 0 : index
      %c0_9 = arith.constant 0 : index
      %11 = vector.load %arg5[%c0_8, %c0_9] : memref<128x128xf32, #tpu.memory_space<vmem>>, vector<128x128xf32>
      tpu.vector_store %arg5[%c0_8, %c0_9], %10 {strides = array<i32>} : memref<128x128xf32, #tpu.memory_space<vmem>>, vector<128x128xf32>,
    } else {
    }
    return
  }
  func.func @transform_0(%arg0: i32, %arg1: i32, %arg2: i32) -> (i32, i32) {
    %c0_i32 = arith.constant 0 : i32
    return %arg0, %arg2 : i32, i32
  }
  func.func @transform_1(%arg0: i32, %arg1: i32, %arg2: i32) -> (i32, i32) {
    %c0_i32 = arith.constant 0 : i32
    return %arg2, %arg1 : i32, i32
  }
  func.func @transform_2(%arg0: i32, %arg1: i32, %arg2: i32) -> (i32, i32) {
    %c0_i32 = arith.constant 0 : i32
    return %arg0, %arg1 : i32, i32
  }
}

</mosaic_0001>

<bundles_post_ra>
// kernel: tpu_custom_call.1
= control target key start
LH: loop header
LB: loop body
LE: loop exit
PB: predicated region body
PF: predicated region fallthrough
CT: control target
= control target key end

     0   :  { %s1871_s0 = inlined_call_operand.hbm [shape: bf16[384,768], index: 0, kind: input, shape index: {}]   ;;  %s1872_s1 = inlined_call_operand.hbm [shape: bf16[768,384], index: 1, kind: input, shape index: {}]   ;;  %s1873_s2 = inlined_call_operand.hbm [shape: f32[384,384], index: 2, kind: output, shape index: {}]  }
   0x1   :  { %1887 = sst [smem:[#allocation20_spill]] %s1871_s0 }
   0x2   :  { %1888 = sst [smem:[#allocation21_spill]] %s1873_s2 }
   0x3   :  { %7 = vsyncpa [#allocation3], 0 }
   0x4   :  { %9 = vsyncpa [#allocation3 + $0x1], 0 }
   0x5   :  { %10 = vsyncpa [#allocation6], 0 }
   0x6   :  { %12 = vsyncpa [#allocation6 + $0x1], 0 }
   0x7   :  { %13 = vsyncpa [#allocation4], 0 }
   0x8   :  { %15 = vsyncpa [#allocation4 + $0x1], 0  ;;  %s1357_s9 = smov 0   ;;  %s1359_s10 = smov 0  }
   0x9   :  { %s1361_s11 = smov 0   ;;  %s1363_s12 = smov 0  }
   0xa   :  { %s1365_s13 = smov 0   ;;  %s1367_s14 = smov 0  }
   0xb   :  { %s1369_s15 = smov 0   ;;  %s1371_s16 = smov 0  }
   0xc   :  { %s1373_s17 = smov 0   ;;  %s1375_s18 = smov 0  }
   0xd   :  { %s1377_s19 = smov 0   ;;  %s1379_s20 = smov 0  }
   0xe   :  { %s1381_s21 = smov 0   ;;  %s1383_s22 = smov 0  }
   0xf   :  { %s1385_s23 = smov 0   ;;  %s1387_s24 = smov 0  }
  0x10 LB: > { %1889 = sst [smem:[#allocation11_spill]] %s1304_s18  ;;  %s766_s25 = sadd.s32 4294967295, %s1328_s24   ;;  %s1328_s24 = sphi %s1387_s24, %s21_s24   ;;  %s1324_s23 = sphi %s1385_s23, %s1946_s23   ;;  %s1320_s22 = sphi %s1383_s22, %s1945_s22   ;;  %s1316_s21 = sphi %s1381_s21, %s1944_s21   ;;  %s1312_s20 = sphi %s1379_s20, %s1929_s20   ;;  %s1308_s19 = sphi %s1377_s19, %s1943_s19   ;;  %s1304_s18 = sphi %s1375_s18, %s1942_s18   ;;  %s1300_s17 = sphi %s1373_s17, %s1941_s17   ;;  %s1296_s16 = sphi %s1371_s16, %s1940_s16   ;;  %s1292_s15 = sphi %s1369_s15, %s1939_s15   ;;  %s1288_s14 = sphi %s1367_s14, %s1938_s14   ;;  %s1284_s13 = sphi %s1365_s13, %s1937_s13   ;;  %s1280_s12 = sphi %s1363_s12, %s1936_s12   ;;  %s1276_s11 = sphi %s1361_s11, %s1935_s11   ;;  %s1272_s10 = sphi %s1359_s10, %s1934_s10   ;;  %s1268_s9 = sphi %s1357_s9, %s1933_s9  }
  0x11   : > { %1890 = sst [smem:[#allocation12_spill]] %s1308_s19  ;;  %s33_s26 = sadd.s32 1, %s1316_s21 }
  0x12   : > { %1891 = sst [smem:[#allocation13_spill]] %s1312_s20  ;;  %p1437_p0 = scmp.ge.s32.totalorder %s33_s26, 3 }
  0x13   : > { %1892 = sst [smem:[#allocation14_spill]] %s1324_s23  ;;  %p56_p1 = scmp.ne.s32.totalorder %s1300_s17, %s1296_s16 }
  0x14   : > { %s1948_s26 = smov (%p1437_p0, %s33_s26), 0  ;;  %p1877_p2 = scmp.eq.s32.totalorder %s1328_s24, 0 }
  0x15   : > { %1894 = sst [smem:[#allocation15_spill]] %s1948_s26  ;;  %p62_p3 = scmp.ne.s32.totalorder %s1296_s16, %s1292_s15 }
  0x16   : > { %s1453_s30 = ssub.s32 %s1316_s21, %s1948_s26  ;;  %p1455_p4 = scmp.eq.s32.totalorder %s766_s25, 0 }
  0x17   : > { %p58_p5 = por %p1877_p2, %p56_p1  ;;  %p1461_p6 = scmp.eq.s32.totalorder %s766_s25, 26 }
  0x18   : > { %s1895_s3 = scalar_select %p1455_p4, 1, 0 }
  0x19   : > { %s1896_s4 = scalar_select %p1461_p6, 1, 0 }
  0x1a   : > { %p1467_p7 = por %p1455_p4, %p62_p3  ;;  %p1876_p8 = scmp.lt.s32.totalorder %s1328_s24, 27 }
  0x1b   : > { %s142_s6 = sand.u32 1, %s1300_s17   ;;  %s772_s8 = sshll.u32 %s1316_s21, 1 }
  0x1c   : > { %s1897_s5 = scalar_select %p1467_p7, 1, 0 }
  0x1d   : > { %s770_s7 = sshll.u32 %s142_s6, 7  ;;  %s903_s15 = smul.u32 96, %s1324_s23 }
  0x1e   : > { %s146_s29 = scalar_lea.vmem [#allocation2], %s770_s7  ;;  %p1479_p9 = pnand %p1876_p8, %p58_p5 }
  0x1f   : > { %s156_s28 = sshll.u32 %s146_s29, 4  ;;  %s153_s26 = sadd.s32 %s903_s15, %s772_s8  ;;  %s1475_s28 = int_to_ptr.vmem [resolvable:$true] %s156_s28 }
  0x20   : > { %s774_s2 = sshll.u32 %s153_s26, 6  ;;  %s1899_s0 = sld [smem:[#allocation20_spill]] }
  0x21   : > { %s1489_s29 = scalar_lea.sflag [#allocation3], %s142_s6  ;;  %p1104_p12 = pneg %p1479_p9 }
  0x26   : > { %s1486_s18 = scalar_lea.hbm %s1899_s0, %s774_s2  ;;  %s1107_s2 = scalar_lea.hbm %s1899_s0, 18432 }
  0x27   : > { %s1102_s7 = scalar_lea.hbm %s1486_s18, 2048  ;;  %p1108_p3 = scmp.lt.u32.totalorder %s1486_s18, %s1899_s0 }
  0x28   : > { %p1103_p11 = scmp.ne.s32.totalorder %s1486_s18, %s1102_s7  ;;  %p1109_p5 = scmp.lt.u32.totalorder %s1107_s2, %s1102_s7 }
  0x29   : > { %p1111_p2 = scmp.lt.u32.totalorder %s1102_s7, %s1486_s18 }
  0x2a   : > { %p1105_p13 = pnand %p1104_p12, %p1103_p11  ;;  %p1110_p8 = por %p1109_p5, %p1108_p3 }
  0x2c   : > { %p1106_p1 = pneg %p1105_p13  ;;  %p1112_p10 = por %p1111_p2, %p1110_p8 }
  0x2e   : > { %p1113_p7 = pnand %p1112_p10, %p1106_p1 }
  0x30   : > { %1116 = shalt.err (!%p1113_p7)
}
  0x31   : > { %s1117_s6 = scalar_lea.vmem %s1475_s28, 2048  ;;  %s1330_s15 = smov [#allocation2]  }
  0x32   : > { %p1118_p11 = scmp.ne.s32.totalorder %s1475_s28, %s1117_s6  ;;  %s1122_s26 = sshll.u32 %s1330_s15, 4  ;;  %s1123_s26 = int_to_ptr.vmem [resolvable:$false] %s1122_s26 }
  0x33   : > { %s1124_s8 = scalar_lea.vmem %s1123_s26, 4096  ;;  %p1125_p4 = scmp.lt.s32.totalorder %s1475_s28, %s1123_s26 }
  0x34   : > { %p1120_p13 = pnand %p1118_p11, %p1104_p12  ;;  %p1126_p3 = scmp.lt.s32.totalorder %s1124_s8, %s1117_s6 }
  0x36   : > { %p1121_p6 = pneg %p1120_p13  ;;  %p1127_p5 = por %p1126_p3, %p1125_p4 }
  0x38   : > { %p1128_p2 = pnand %p1127_p5, %p1121_p6 }
  0x3a   : > { %1131 = shalt.err (!%p1128_p2)
}
  0x3b   : > { %s1331_s7 = smov 384   ;;  %s1332_s2 = smov 128  }
  0x3c   : > { %s1333_s19 = smov 8   ;;  %p187_p4 = scmp.lt.s32.totalorder %s1328_s24, 28 }
  0x3d   : > { %915 = dma.hbm_to_vmem [thread:$0]  (!%p1479_p9), %s1486_s18, 2048, %s1475_s28, %s1489_s29, %s1331_s7, %s1332_s2, %s1333_s19  }
  0x3e   : > { %p1900_p6 = scmp.ge.s32.totalorder %s1328_s24, 1  ;;  %s767_s6 = sadd.s32 4294967294, %s1328_s24  }
  0x3f   : > { %s36_s15 = sadd.s32 1, %s1320_s22  ;;  %s77_s26 = sadd.s32 1, %s1288_s14 }
  0x40   : > { %p1520_p7 = pnand %p1900_p6, %p187_p4  ;;  %s1950_s15 = smov (!%p1437_p0, %s36_s15), %s1320_s22 }
  0x41   : > { %p84_p8 = scmp.ne.s32.totalorder %s1288_s14, %s1284_s13  ;;  %p38_p10 = scmp.ge.s32.totalorder %s1950_s15, 3 }
  0x42   : > { %p90_p9 = scmp.ne.s32.totalorder %s1284_s13, %s1280_s12  ;;  %p1902_p12 = scmp.eq.s32.totalorder %s1328_s24, 0 }
  0x43   : > { %s105_s28 = sadd.s32 1, %s1276_s11  ;;  %s1952_s15 = smov (%p38_p10, %s1950_s15), 0 }
  0x44   : > { %p1536_p1 = por %p84_p8, %p1902_p12  ;;  %1904 = sst [smem:[#allocation16_spill]] %s1952_s15 }
  0x45   : > { %s1905_s25 = sadd.s32 1, %s1324_s23  ;;  %s73_s27 = ssub.s32 %s1320_s22, %s1952_s15 }
  0x46   : > { %s1954_s25 = smov (!%p38_p10, %s1905_s25), %s1324_s23  ;;  %p1906_p0 = scmp.ne.s32.totalorder %s1895_s3, 0 }
  0x47   : > { %p42_p13 = scmp.ge.s32.totalorder %s1954_s25, 3  ;;  %s74_s12 = sor.u32 %s73_s27, %s1453_s30 }
  0x48   : > { %p1550_p11 = por %p90_p9, %p1906_p0  ;;  %p75_p3 = scmp.eq.s32.totalorder %s74_s12, 0 }
  0x49   : > { %p115_p5 = scmp.ne.s32.totalorder %s1276_s11, %s1272_s10  ;;  %s1956_s25 = smov (%p42_p13, %s1954_s25), 0 }
  0x4a   : > { %s1907_s29 = scalar_select %p1550_p11, 1, 0 }
  0x4b   : > { %1908 = sst [smem:[#allocation17_spill]] %s1956_s25  ;;  %s44_s7 = ssub.s32 %s1324_s23, %s1956_s25 }
  0x4c   : > { %s1560_s8 = scalar_select %p75_p3, %s1288_s14, %s77_s26  }
  0x4d   : > { %p1910_p2 = scmp.ne.s32.totalorder %s1896_s4, 0  ;;  %s46_s2 = sor.u32 %s1453_s30, %s44_s7 }
  0x4e   : > { %1909 = sst [smem:[#allocation18_spill]] %s1560_s8  ;;  %s102_s19 = sor.u32 %s73_s27, %s44_s7 }
  0x4f   : > { %p1566_p4 = por %p1910_p2, %p115_p5  ;;  %p47_p6 = scmp.eq.s32.totalorder %s46_s2, 0 }
  0x50   : > { %p103_p8 = scmp.eq.s32.totalorder %s102_s19, 0  ;;  %p121_p10 = scmp.ne.s32.totalorder %s1272_s10, %s1268_s9 }
  0x51   : > { %s1911_s3 = scalar_select %p1566_p4, 1, 0 }
  0x52   : > { %p122_p9 = scmp.eq.s32.totalorder %s767_s6, 26  ;;  %s1913_s12 = sadd.s32 1, %s1300_s17 }
  0x53   : > { %1912 = sst [smem:[#allocation19_spill]] %s1911_s3  ;;  %s166_s25 = sand.u32 1, %s1288_s14  }
  0x54   : > { %s1576_s0 = scalar_select %p47_p6, %s1300_s17, %s1913_s12  }
  0x55   : > { %s1579_s26 = scalar_select %p103_p8, %s1276_s11, %s105_s28  }
  0x56   : > { %p1581_p12 = por %p122_p9, %p121_p10  ;;  %s775_s15 = sshll.u32 %s166_s25, 7 }
  0x57   : > { %s904_s23 = smul.u32 96, %s1316_s21  ;;  %s170_s8 = scalar_lea.vmem [#allocation5], %s775_s15 }
  0x58   : > { %s1914_s4 = scalar_select %p1581_p12, 1, 0 }
  0x59   : > { %s179_s3 = sshll.u32 %s170_s8, 4  ;;  %p1915_p0 = scmp.lt.s32.totalorder %s1328_s24, 27  ;;  %s1596_s3 = int_to_ptr.vmem [resolvable:$true] %s179_s3 }
  0x5a   : > { %s176_s6 = sadd.s32 %s1320_s22, %s904_s23  ;;  %s1603_s15 = scalar_lea.sflag [#allocation6], %s166_s25 }
  0x5b   : > { %p1591_p13 = pnand %p1915_p0, %p1536_p1  ;;  %s778_s28 = sshll.u32 %s176_s6, 6 }
  0x5c   : > { %s1601_s2 = scalar_lea.hbm %s1872_s1, %s778_s28  ;;  %s1137_s19 = scalar_lea.hbm %s1872_s1, 18432 }
  0x5d   : > { %s1132_s18 = scalar_lea.hbm %s1601_s2, 2048  ;;  %p1134_p3 = pneg %p1591_p13 }
  0x5e   : > { %p1133_p1 = scmp.ne.s32.totalorder %s1601_s2, %s1132_s18  ;;  %p1138_p6 = scmp.lt.u32.totalorder %s1601_s2, %s1872_s1 }
  0x5f   : > { %p1139_p8 = scmp.lt.u32.totalorder %s1137_s19, %s1132_s18  ;;  %p1141_p9 = scmp.lt.u32.totalorder %s1132_s18, %s1601_s2 }
  0x60   : > { %p1135_p5 = pnand %p1134_p3, %p1133_p1 }
  0x61   : > { %p1140_p10 = por %p1139_p8, %p1138_p6 }
  0x62   : > { %p1136_p2 = pneg %p1135_p5 }
  0x63   : > { %p1142_p0 = por %p1141_p9, %p1140_p10 }
  0x65   : > { %p1143_p12 = pnand %p1142_p0, %p1136_p2 }
  0x67   : > { %1146 = shalt.err (!%p1143_p12)
}
  0x68   : > { %s1147_s25 = scalar_lea.vmem %s1596_s3, 2048  ;;  %s1334_s28 = smov [#allocation5]  }
  0x69   : > { %p1148_p1 = scmp.ne.s32.totalorder %s1596_s3, %s1147_s25  ;;  %s1152_s27 = sshll.u32 %s1334_s28, 4  ;;  %s1153_s27 = int_to_ptr.vmem [resolvable:$false] %s1152_s27 }
  0x6a   : > { %s1154_s7 = scalar_lea.vmem %s1153_s27, 4096  ;;  %p1155_p11 = scmp.lt.s32.totalorder %s1596_s3, %s1153_s27 }
  0x6b   : > { %p1150_p5 = pnand %p1148_p1, %p1134_p3  ;;  %p1156_p6 = scmp.lt.s32.totalorder %s1154_s7, %s1147_s25 }
  0x6d   : > { %p1151_p4 = pneg %p1150_p5  ;;  %p1157_p8 = por %p1156_p6, %p1155_p11 }
  0x6f   : > { %p1158_p10 = pnand %p1157_p8, %p1151_p4 }
  0x71   : > { %1161 = shalt.err (!%p1158_p10)
}
  0x72   : > { %s1335_s18 = smov 192   ;;  %s1336_s23 = smov 64  }
  0x73   : > { %s1337_s8 = smov 4   ;;  %191 = sbr.rel (%p1520_p7) target bundleno = 450 (0x1c2), region = 28 }
  0x74   : > { %918 = dma.hbm_to_vmem [thread:$0]  (!%p1591_p13), %s1601_s2, 2048, %s1596_s3, %s1603_s15, %s1335_s18, %s1336_s23, %s1337_s8  }
  0x75   : > { %s193_s19 = sand.u32 (!%p1520_p7), 1, %s1296_s16   ;;  %p1917_p11 = scmp.ne.s32.totalorder (!%p1520_p7), %s1897_s5, 0 }
  0x76   : > { %s780_s12 = sshll.u32 (!%p1520_p7), %s193_s19, 7  ;;  %s194_s6 = scalar_lea.sflag (!%p1520_p7), [#allocation3], %s193_s19 }
  0x77   : > { %s1634_s25 = scalar_lea.vmem (!%p1520_p7), [#allocation2], %s780_s12 }
  0x7a   : > { %1255 = dma.done.wait (%p1917_p11), %s194_s6, 2048  }
  0x7b   : > { %1257 = vsyncadd (%p1917_p11), %s194_s6, 4294965248  ;;  %s202_s28 = sand.u32 1, %s1284_s13   ;;  %p1918_p7 = scmp.ne.s32.totalorder %s1907_s29, 0 }
  0x7c   : > { %s781_s30 = sshll.u32 %s202_s28, 7  ;;  %s203_s3 = scalar_lea.sflag [#allocation6], %s202_s28 }
  0x7d   : > { %s1641_s2 = scalar_lea.vmem [#allocation5], %s781_s30 }
  0x7e   : > { %1259 = dma.done.wait (%p1918_p7), %s203_s3, 2048  }
  0x7f   : > { %1261 = vsyncadd (%p1918_p7), %s203_s3, 4294965248  ;;  %s229_s5 = sand.u32 1, %s1272_s10   ;;  %v1062_v0 = vld [vmem:[%s1641_s2 + $0x40] sm:$0xff]   ;;  %v1064_v2 = vld [vmem:[%s1641_s2 + $0x48] sm:$0xff]   ;;  %s1919_s15 = sld [smem:[#allocation11_spill]] }
  0x80   : > { %s1650_s20 = sshll.u32 %s229_s5, 7  ;;  %v1063_v1 = vld [vmem:[%s1641_s2] sm:$0xff]   ;;  %823 = vmatprep.subr.bf16.mxu0 %v1062_v0  ;;  %887 = vmatprep.subr.bf16.mxu1 %v1062_v0  ;;  %v1065_v3 = vld [vmem:[%s1641_s2 + $0x8] sm:$0xff]   ;;  %v1066_v4 = vld [vmem:[%s1641_s2 + $0x50] sm:$0xff]  }
  0x81   : > { %824 = vmatpush3.bf16.msra.mxu0 %v1063_v1  ;;  %895 = vmatpush3.bf16.msra.mxu1 %v1063_v1  ;;  %v1067_v5 = vld [vmem:[%s1641_s2 + $0x10] sm:$0xff]   ;;  %v1068_v6 = vld [vmem:[%s1641_s2 + $0x58] sm:$0xff]   ;;  %v1070_v8 = vld [vmem:[%s1641_s2 + $0x60] sm:$0xff]   ;;  %s1705_s29 = scalar_lea.vmem [#allocation7], %s1650_s20 }
  0x82   : > { %825 = vmatprep.subr.bf16.mxu0 %v1064_v2  ;;  %888 = vmatprep.subr.bf16.mxu1 %v1064_v2  ;;  %v1069_v7 = vld [vmem:[%s1641_s2 + $0x18] sm:$0xff]   ;;  %v1071_v9 = vld [vmem:[%s1641_s2 + $0x20] sm:$0xff]   ;;  %v1072_v10 = vld [vmem:[%s1641_s2 + $0x68] sm:$0xff]  }
  0x83   : > { %v1080_v11 = vld [vmem:[%s1634_s25 + $0x4] ss:$8 sps:$4 sm:$0xff]   ;;  %v1074_v14 = vld [vmem:[%s1641_s2 + $0x70] sm:$0xff]   ;;  %v1076_v16 = vld [vmem:[%s1641_s2 + $0x78] sm:$0xff]  }
  0x84   : > { %v1083_v12 = vld [vmem:[%s1634_s25 + $0x44] ss:$8 sps:$4 sm:$0xff]   ;;  %493 = vmatprep.mubr.bf16.mxu0 %v1080_v11  ;;  %v1075_v15 = vld [vmem:[%s1641_s2 + $0x30] sm:$0xff]   ;;  %v1077_v17 = vld [vmem:[%s1641_s2 + $0x38] sm:$0xff]  }
  0x85   : > { %826 = vmatpush3.bf16.msra.mxu0 %v1065_v3  ;;  %896 = vmatpush3.bf16.msra.mxu1 %v1065_v3  ;;  %v1073_v13 = vld [vmem:[%s1641_s2 + $0x28] sm:$0xff]   ;;  %v1084_v20 = vld [vmem:[%s1634_s25 + $0x14] ss:$8 sps:$4 sm:$0xff]   ;;  %v1088_v22 = vld [vmem:[%s1634_s25 + $0x10] ss:$8 sps:$4 sm:$0xff]   ;;  %p815_p4 = scmp.ne.s32.totalorder %s1919_s15, 0 }
  0x86   : > { %827 = vmatprep.subr.bf16.mxu0 %v1066_v4  ;;  %889 = vmatprep.subr.bf16.mxu1 %v1066_v4  ;;  %v1078_v18 = vld [vmem:[%s1634_s25] ss:$8 sps:$4 sm:$0xff]   ;;  %v1086_v21 = vld [vmem:[%s1634_s25 + $0x54] ss:$8 sps:$4 sm:$0xff]   ;;  %v1089_v23 = vld [vmem:[%s1634_s25 + $0x50] ss:$8 sps:$4 sm:$0xff]  }
  0x87   : > { %525 = vmatprep.mubr.bf16.mxu1 %v1083_v12  ;;  %v1081_v19 = vld [vmem:[%s1634_s25 + $0x40] ss:$8 sps:$4 sm:$0xff]   ;;  %v1090_v24 = vld [vmem:[%s1634_s25 + $0x24] ss:$8 sps:$4 sm:$0xff]   ;;  %v1096_v28 = vld [vmem:[%s1634_s25 + $0x34] ss:$8 sps:$4 sm:$0xff]  }
  0x88   : > { %v1092_v25 = vld [vmem:[%s1634_s25 + $0x64] ss:$8 sps:$4 sm:$0xff]   ;;  %v1094_v26 = vld [vmem:[%s1634_s25 + $0x20] ss:$8 sps:$4 sm:$0xff]   ;;  %v1098_v29 = vld [vmem:[%s1634_s25 + $0x74] ss:$8 sps:$4 sm:$0xff]  }
  0x89   : > { %828 = vmatpush3.bf16.msra.mxu0 %v1067_v5  ;;  %897 = vmatpush3.bf16.msra.mxu1 %v1067_v5  ;;  %v1095_v27 = vld [vmem:[%s1634_s25 + $0x60] ss:$8 sps:$4 sm:$0xff]   ;;  %v1100_v30 = vld [vmem:[%s1634_s25 + $0x30] ss:$8 sps:$4 sm:$0xff]  }
  0x8a   : > { %829 = vmatprep.subr.bf16.mxu0 %v1068_v6  ;;  %890 = vmatprep.subr.bf16.mxu1 %v1068_v6  ;;  %v1101_v31 = vld [vmem:[%s1634_s25 + $0x70] ss:$8 sps:$4 sm:$0xff]  }
  0x8d   : > { %830 = vmatpush3.bf16.msra.mxu0 %v1069_v7  ;;  %898 = vmatpush3.bf16.msra.mxu1 %v1069_v7 }
  0x8e   : > { %831 = vmatprep.subr.bf16.mxu0 %v1070_v8  ;;  %891 = vmatprep.subr.bf16.mxu1 %v1070_v8 }
  0x91   : > { %832 = vmatpush3.bf16.msra.mxu0 %v1071_v9  ;;  %899 = vmatpush3.bf16.msra.mxu1 %v1071_v9 }
  0x92   : > { %833 = vmatprep.subr.bf16.mxu0 %v1072_v10  ;;  %892 = vmatprep.subr.bf16.mxu1 %v1072_v10 }
  0x95   : > { %834 = vmatpush3.bf16.msra.mxu0 %v1073_v13  ;;  %900 = vmatpush3.bf16.msra.mxu1 %v1073_v13 }
  0x96   : > { %835 = vmatprep.subr.bf16.mxu0 %v1074_v14  ;;  %893 = vmatprep.subr.bf16.mxu1 %v1074_v14 }
  0x99   : > { %836 = vmatpush3.bf16.msra.mxu0 %v1075_v15  ;;  %901 = vmatpush3.bf16.msra.mxu1 %v1075_v15 }
  0x9a   : > { %837 = vmatprep.subr.bf16.mxu0 %v1076_v16  ;;  %894 = vmatprep.subr.bf16.mxu1 %v1076_v16 }
  0x9d   : > { %838 = vmatpush3.bf16.msra.mxu0 %v1077_v17  ;;  %902 = vmatpush3.bf16.msra.mxu1 %v1077_v17 }
  0xa0   : > { %494 = vmatmul.mubr.bf16.vlgmr.msra.gmra.mrb[0].mxu0 %v1078_v18  ;;  %526 = vmatmul.mubr.bf16.vlgmr.msra.gmra.mrb[0].mxu1 %v1081_v19 }
  0xa1   : > { %501 = vmatprep.mubr.bf16.mxu0 %v1084_v20  ;;  %533 = vmatprep.mubr.bf16.mxu1 %v1086_v21 }
  0xa8   : > { %502 = vmatmul.mubr.bf16.gmra.mrb[4].mxu0 %v1088_v22  ;;  %534 = vmatmul.mubr.bf16.gmra.mrb[4].mxu1 %v1089_v23 }
  0xa9   : > { %509 = vmatprep.mubr.bf16.mxu0 %v1090_v24  ;;  %541 = vmatprep.mubr.bf16.mxu1 %v1092_v25 }
  0xb0   : > { %510 = vmatmul.mubr.bf16.gmra.mrb[8].mxu0 %v1094_v26  ;;  %542 = vmatmul.mubr.bf16.gmra.mrb[8].mxu1 %v1095_v27 }
  0xb1   : > { %517 = vmatprep.mubr.bf16.mxu0 %v1096_v28  ;;  %549 = vmatprep.mubr.bf16.mxu1 %v1098_v29 }
  0xb8   : > { %518 = vmatmul.mubr.bf16.gmra.mrb[12].mxu0 %v1100_v30  ;;  %550 = vmatmul.mubr.bf16.gmra.mrb[12].mxu1 %v1101_v31 }
 0x173   : > { %v839_v32 = vpop.f32.mrb[0].mxu0  ;;  %v863_v33 = vpop.f32.mrb[0].mxu1 }
 0x174   : > { %v840_v34 = vpop.f32.mrb[1].mxu0  ;;  %v864_v35 = vpop.f32.mrb[1].mxu1 }
 0x175   : > { %v1684_v36 = vadd.f32 %v840_v34, %v839_v32  ;;  %v1686_v37 = vadd.f32 %v864_v35, %v863_v33  ;;  %v842_v38 = vpop.f32.mrb[2].mxu0  ;;  %v866_v39 = vpop.f32.mrb[2].mxu1 }
 0x176   : > { %v843_v40 = vpop.f32.mrb[3].mxu0  ;;  %v867_v41 = vpop.f32.mrb[3].mxu1 }
 0x177   : > { %v1688_v42 = vadd.f32 %v843_v40, %v842_v38  ;;  %v1690_v43 = vadd.f32 %v867_v41, %v866_v39  ;;  %562 = vst [vmem:[%s1705_s29] sm:$0xff] (!%p815_p4), %v1684_v36  ;;  %570 = vst [vmem:[%s1705_s29 + $0x40] sm:$0xff] (!%p815_p4), %v1686_v37 }
 0x179   : > { %563 = vst [vmem:[%s1705_s29 + $0x8] sm:$0xff] (!%p815_p4), %v1688_v42  ;;  %571 = vst [vmem:[%s1705_s29 + $0x48] sm:$0xff] (!%p815_p4), %v1690_v43 }
 0x17b   : > { %v845_v44 = vpop.f32.mrb[4].mxu0  ;;  %v869_v45 = vpop.f32.mrb[4].mxu1 }
 0x17c   : > { %v846_v46 = vpop.f32.mrb[5].mxu0  ;;  %v870_v47 = vpop.f32.mrb[5].mxu1 }
 0x17d   : > { %v847_v48 = vadd.f32 %v846_v46, %v845_v44  ;;  %v1692_v49 = vadd.f32 %v870_v47, %v869_v45  ;;  %v848_v50 = vpop.f32.mrb[6].mxu0  ;;  %v872_v51 = vpop.f32.mrb[6].mxu1 }
 0x17e   : > { %v849_v52 = vpop.f32.mrb[7].mxu0  ;;  %v873_v53 = vpop.f32.mrb[7].mxu1 }
 0x17f   : > { %v850_v54 = vadd.f32 %v849_v52, %v848_v50  ;;  %v1694_v55 = vadd.f32 %v873_v53, %v872_v51  ;;  %564 = vst [vmem:[%s1705_s29 + $0x10] sm:$0xff] (!%p815_p4), %v847_v48  ;;  %572 = vst [vmem:[%s1705_s29 + $0x50] sm:$0xff] (!%p815_p4), %v1692_v49 }
 0x181   : > { %565 = vst [vmem:[%s1705_s29 + $0x18] sm:$0xff] (!%p815_p4), %v850_v54  ;;  %573 = vst [vmem:[%s1705_s29 + $0x58] sm:$0xff] (!%p815_p4), %v1694_v55 }
 0x183   : > { %v851_v56 = vpop.f32.mrb[8].mxu0  ;;  %v875_v57 = vpop.f32.mrb[8].mxu1 }
 0x184   : > { %v852_v58 = vpop.f32.mrb[9].mxu0  ;;  %v876_v59 = vpop.f32.mrb[9].mxu1 }
 0x185   : > { %v853_v60 = vadd.f32 %v852_v58, %v851_v56  ;;  %v1696_v61 = vadd.f32 %v876_v59, %v875_v57  ;;  %v854_v62 = vpop.f32.mrb[10].mxu0  ;;  %v878_v63 = vpop.f32.mrb[10].mxu1 }
 0x186   : > { %v855_v0 = vpop.f32.mrb[11].mxu0  ;;  %v879_v1 = vpop.f32.mrb[11].mxu1 }
 0x187   : > { %v856_v2 = vadd.f32 %v855_v0, %v854_v62  ;;  %v1698_v3 = vadd.f32 %v879_v1, %v878_v63  ;;  %566 = vst [vmem:[%s1705_s29 + $0x20] sm:$0xff] (!%p815_p4), %v853_v60  ;;  %574 = vst [vmem:[%s1705_s29 + $0x60] sm:$0xff] (!%p815_p4), %v1696_v61 }
 0x189   : > { %561 = sbr.rel (%p815_p4) target bundleno = 402 (0x192), region = 40  ;;  %567 = vst [vmem:[%s1705_s29 + $0x28] sm:$0xff] (!%p815_p4), %v856_v2  ;;  %575 = vst [vmem:[%s1705_s29 + $0x68] sm:$0xff] (!%p815_p4), %v1698_v3 }
 0x18b   : > { %v857_v4 = vpop.f32.mrb[12].mxu0  ;;  %v881_v5 = vpop.f32.mrb[12].mxu1 }
 0x18c   : > { %v858_v6 = vpop.f32.mrb[13].mxu0  ;;  %v882_v7 = vpop.f32.mrb[13].mxu1 }
 0x18d   : > { %v859_v8 = vadd.f32 %v858_v6, %v857_v4  ;;  %v1700_v9 = vadd.f32 %v882_v7, %v881_v5  ;;  %v860_v10 = vpop.f32.mrb[14].mxu0  ;;  %v884_v11 = vpop.f32.mrb[14].mxu1 }
 0x18e   : > { %v861_v12 = vpop.f32.mrb[15].mxu0  ;;  %v885_v13 = vpop.f32.mrb[15].mxu1 }
 0x18f   : > { %v862_v14 = vadd.f32 %v861_v12, %v860_v10  ;;  %v1702_v15 = vadd.f32 %v885_v13, %v884_v11  ;;  %568 = vst [vmem:[%s1705_s29 + $0x30] sm:$0xff] (!%p815_p4), %v859_v8  ;;  %576 = vst [vmem:[%s1705_s29 + $0x70] sm:$0xff] (!%p815_p4), %v1700_v9 }
 0x191   : > { %569 = vst [vmem:[%s1705_s29 + $0x38] sm:$0xff] %v862_v14  ;;  %577 = vst [vmem:[%s1705_s29 + $0x78] sm:$0xff] %v1702_v15 }
 0x192 PF: > { %s1920_s27 = sld [smem:[#allocation11_spill]] }
 0x198   : > { %p816_p12 = scmp.eq.s32.totalorder %s1920_s27, 0 }
 0x199   : > { %v582_v16 = vld [vmem:[%s1705_s29] sm:$0xff] (!%p816_p12)  ;;  %v583_v17 = vld [vmem:[%s1705_s29 + $0x8] sm:$0xff] (!%p816_p12)  ;;  %v584_v18 = vld [vmem:[%s1705_s29 + $0x10] sm:$0xff] (!%p816_p12) }
 0x19a   : > { %581 = sbr.rel (%p816_p12) target bundleno = 420 (0x1a4), region = 44  ;;  %v598_v19 = vadd.f32 (!%p816_p12), %v1684_v36, %v582_v16  ;;  %v599_v20 = vadd.f32 (!%p816_p12), %v1688_v42, %v583_v17  ;;  %v600_v21 = vadd.f32 (!%p816_p12), %v847_v48, %v584_v18  ;;  %v585_v22 = vld [vmem:[%s1705_s29 + $0x18] sm:$0xff] (!%p816_p12)  ;;  %v586_v23 = vld [vmem:[%s1705_s29 + $0x20] sm:$0xff] (!%p816_p12)  ;;  %v587_v24 = vld [vmem:[%s1705_s29 + $0x28] sm:$0xff] (!%p816_p12) }
 0x19b   : > { %v601_v25 = vadd.f32 (!%p816_p12), %v850_v54, %v585_v22  ;;  %v602_v26 = vadd.f32 (!%p816_p12), %v853_v60, %v586_v23  ;;  %v603_v27 = vadd.f32 (!%p816_p12), %v856_v2, %v587_v24  ;;  %v588_v28 = vld [vmem:[%s1705_s29 + $0x30] sm:$0xff] (!%p816_p12)  ;;  %v589_v29 = vld [vmem:[%s1705_s29 + $0x38] sm:$0xff] (!%p816_p12)  ;;  %v590_v30 = vld [vmem:[%s1705_s29 + $0x40] sm:$0xff] (!%p816_p12) }
 0x19c   : > { %614 = vst [vmem:[%s1705_s29] sm:$0xff] (!%p816_p12), %v598_v19  ;;  %615 = vst [vmem:[%s1705_s29 + $0x8] sm:$0xff] (!%p816_p12), %v599_v20  ;;  %v604_v31 = vadd.f32 (!%p816_p12), %v859_v8, %v588_v28  ;;  %v605_v32 = vadd.f32 (!%p816_p12), %v862_v14, %v589_v29  ;;  %v606_v33 = vadd.f32 (!%p816_p12), %v1686_v37, %v590_v30  ;;  %v591_v34 = vld [vmem:[%s1705_s29 + $0x48] sm:$0xff] (!%p816_p12)  ;;  %v592_v35 = vld [vmem:[%s1705_s29 + $0x50] sm:$0xff] (!%p816_p12) }
 0x19d   : > { %616 = vst [vmem:[%s1705_s29 + $0x10] sm:$0xff] (!%p816_p12), %v600_v21  ;;  %v593_v36 = vld [vmem:[%s1705_s29 + $0x58] sm:$0xff] (!%p816_p12)  ;;  %617 = vst [vmem:[%s1705_s29 + $0x18] sm:$0xff] (!%p816_p12), %v601_v25  ;;  %v607_v38 = vadd.f32 (!%p816_p12), %v1690_v43, %v591_v34  ;;  %v608_v39 = vadd.f32 (!%p816_p12), %v1692_v49, %v592_v35  ;;  %v594_v41 = vld [vmem:[%s1705_s29 + $0x60] sm:$0xff] (!%p816_p12) }
 0x19e   : > { %618 = vst [vmem:[%s1705_s29 + $0x20] sm:$0xff] (!%p816_p12), %v602_v26  ;;  %619 = vst [vmem:[%s1705_s29 + $0x28] sm:$0xff] (!%p816_p12), %v603_v27  ;;  %v609_v40 = vadd.f32 (!%p816_p12), %v1694_v55, %v593_v36  ;;  %v595_v37 = vld [vmem:[%s1705_s29 + $0x68] sm:$0xff] (!%p816_p12)  ;;  %v596_v42 = vld [vmem:[%s1705_s29 + $0x70] sm:$0xff] (!%p816_p12)  ;;  %v610_v44 = vadd.f32 (!%p816_p12), %v1696_v61, %v594_v41 }
 0x19f   : > { %620 = vst [vmem:[%s1705_s29 + $0x30] sm:$0xff] (!%p816_p12), %v604_v31  ;;  %621 = vst [vmem:[%s1705_s29 + $0x38] sm:$0xff] (!%p816_p12), %v605_v32  ;;  %v611_v45 = vadd.f32 (!%p816_p12), %v1698_v3, %v595_v37  ;;  %v612_v43 = vadd.f32 (!%p816_p12), %v1700_v9, %v596_v42  ;;  %v597_v46 = vld [vmem:[%s1705_s29 + $0x78] sm:$0xff] (!%p816_p12) }
 0x1a0   : > { %622 = vst [vmem:[%s1705_s29 + $0x40] sm:$0xff] (!%p816_p12), %v606_v33  ;;  %623 = vst [vmem:[%s1705_s29 + $0x48] sm:$0xff] (!%p816_p12), %v607_v38  ;;  %v613_v47 = vadd.f32 (!%p816_p12), %v1702_v15, %v597_v46 }
 0x1a1   : > { %624 = vst [vmem:[%s1705_s29 + $0x50] sm:$0xff] %v608_v39  ;;  %625 = vst [vmem:[%s1705_s29 + $0x58] sm:$0xff] %v609_v40 }
 0x1a2   : > { %626 = vst [vmem:[%s1705_s29 + $0x60] sm:$0xff] %v610_v44  ;;  %627 = vst [vmem:[%s1705_s29 + $0x68] sm:$0xff] %v611_v45 }
 0x1a3   : > { %628 = vst [vmem:[%s1705_s29 + $0x70] sm:$0xff] %v612_v43  ;;  %629 = vst [vmem:[%s1705_s29 + $0x78] sm:$0xff] %v613_v47 }
 0x1a4 PF: > { %s1921_s7 = sld [smem:[#allocation13_spill]]  ;;  %s1922_s18 = sld [smem:[#allocation12_spill]] }
 0x1a5   : > { %s1923_s23 = sld [smem:[#allocation19_spill]]  ;;  %s646_s19 = sshll.u32 %s1705_s29, 4  ;;  %s1780_s19 = int_to_ptr.vmem [resolvable:$true] %s646_s19 }
 0x1a6   : > { %s1924_s30 = sld [smem:[#allocation21_spill]]  ;;  %s1789_s2 = scalar_lea.sflag [#allocation4], %s229_s5 }
 0x1a7   : > { %s1162_s20 = scalar_lea.vmem %s1780_s19, 2048  ;;  %s1338_s29 = smov [#allocation7]  }
 0x1a8   : > { %p1163_p13 = scmp.ne.s32.totalorder %s1780_s19, %s1162_s20  ;;  %s1166_s15 = sshll.u32 %s1338_s29, 4  ;;  %s1167_s15 = int_to_ptr.vmem [resolvable:$false] %s1166_s15 }
 0x1a9   : > { %s1168_s27 = scalar_lea.vmem %s1167_s15, 4096  ;;  %p1169_p0 = scmp.lt.s32.totalorder %s1780_s19, %s1167_s15 }
 0x1aa   : > { %s905_s8 = smul.u32 48, %s1921_s7  ;;  %p1170_p1 = scmp.lt.s32.totalorder %s1168_s27, %s1162_s20 }
 0x1ab   : > { %p1925_p3 = scmp.ne.s32.totalorder %s1923_s23, 0 }
 0x1ac   : > { %s643_s12 = sadd.s32 %s1922_s18, %s905_s8  ;;  %p1171_p5 = por %p1170_p1, %p1169_p0 }
 0x1ad   : > { %s820_s6 = sshll.u32 %s643_s12, 7  ;;  %p1164_p2 = pnand %p1163_p13, %p1925_p3 }
 0x1ae   : > { %s1785_s3 = scalar_lea.hbm %s1924_s30, %s820_s6 }
 0x1af   : > { %p1165_p9 = pneg %p1164_p2 }
 0x1b1   : > { %p1172_p6 = pnand %p1171_p5, %p1165_p9 }
 0x1b3   : > { %1175 = shalt.err (!%p1172_p6)
}
 0x1b4   : > { %s1176_s5 = scalar_lea.hbm %s1785_s3, 2048  ;;  %s1180_s8 = scalar_lea.hbm %s1924_s30, 18432 }
 0x1b5   : > { %p1177_p8 = scmp.ne.s32.totalorder %s1785_s3, %s1176_s5  ;;  %p1181_p7 = scmp.lt.u32.totalorder %s1785_s3, %s1924_s30 }
 0x1b6   : > { %p1182_p4 = scmp.lt.u32.totalorder %s1180_s8, %s1176_s5  ;;  %p1184_p13 = scmp.lt.u32.totalorder %s1176_s5, %s1785_s3 }
 0x1b7   : > { %p1178_p10 = pnand %p1177_p8, %p1925_p3 }
 0x1b8   : > { %p1183_p12 = por %p1182_p4, %p1181_p7 }
 0x1b9   : > { %p1179_p11 = pneg %p1178_p10 }
 0x1ba   : > { %p1185_p2 = por %p1184_p13, %p1183_p12 }
 0x1bc   : > { %p1186_p9 = pnand %p1185_p2, %p1179_p11 }
 0x1be   : > { %1189 = shalt.err (!%p1186_p9)
}
 0x1bf   : > { %s1339_s25 = smov 128   ;;  %s1340_s28 = smov 384  }
 0x1c0   : > { %s1341_s20 = smov 8  }
 0x1c1   : > { %910 = dma.vmem_to_hbm [thread:$0]  (%p1925_p3), %s1780_s19, 2048, %s1785_s3, %s1789_s2, %s1339_s25, %s1340_s28, %s1341_s20  }
 0x1c2 PF: > { %p924_p0 = scmp.ge.s32.totalorder %s1328_s24, 2  ;;  %s661_s29 = sand.u32 1, %s1268_s9  }
 0x1c3   : > { %p1926_p1 = scmp.ne.s32.totalorder %s1914_s4, 0  ;;  %s662_s15 = scalar_lea.sflag [#allocation4], %s661_s29 }
 0x1c5   : > { %p920_p5 = pnand %p924_p0, %p1926_p1 }
 0x1c7   : > { %1263 = dma.done.wait (!%p920_p5), %s662_s15, 2048  }
 0x1c8   : > { %1265 = vsyncadd (!%p920_p5), %s662_s15, 4294965248  ;;  %s21_s24 = sadd.s32 1, %s1328_s24   ;;  %s1928_s23 = sld [smem:[#allocation18_spill]] }
 0x1c9   : > { %p1818_p6 = scmp.ge.s32.totalorder %s21_s24, 29   ;;  %s1929_s20 = sld [smem:[#allocation14_spill]] }
 0x1ca   : > { %s1930_s4 = sld [smem:[#allocation15_spill]]  ;;  %s1931_s3 = sld [smem:[#allocation16_spill]] }
 0x1cb   : > { %s1932_s2 = sld [smem:[#allocation17_spill]]  ;;  %s1933_s9 = smov %s1272_s10 }
 0x1cc   : > { %s1934_s10 = smov %s1276_s11  ;;  %s1935_s11 = smov %s1579_s26 }
 0x1cd   : > { %s1936_s12 = smov %s1284_s13  ;;  %s1937_s13 = smov %s1288_s14 }
 0x1ce   : > { %s1938_s14 = smov %s1928_s23  ;;  %s1939_s15 = smov %s1296_s16 }
 0x1cf   : > { %s1940_s16 = smov %s1300_s17  ;;  %s1941_s17 = smov %s1576_s0 }
 0x1d0   : > { %s1942_s18 = smov %s1316_s21  ;;  %s1943_s19 = smov %s1320_s22 }
 0x1d1   : > { %s1944_s21 = smov %s1930_s4  ;;  %s1945_s22 = smov %s1931_s3 }
 0x1d2   : > { %s1946_s23 = smov %s1932_s2  ;;  %20 = sbr.rel (!%p1818_p6) target bundleno = 16 (0x10), region = 94 }
 0x1d9   :  { %667 = vsyncpa [#allocation3], 1 }
 0x1da   :  { %669 = vsyncpa [#allocation3 + $0x1], 1 }
 0x1db   :  { %670 = vsyncpa [#allocation6], 1 }
 0x1dc   :  { %672 = vsyncpa [#allocation6 + $0x1], 1 }
 0x1dd   :  { %673 = vsyncpa [#allocation4], 1 }
 0x1de   :  { %675 = vsyncpa [#allocation4 + $0x1], 1 }

</bundles_post_ra>
